<compile_context>
chip_gen: v7x
topology: tpu7x:2x2x1
jax: 0.10.0
libtpu: 0.0.40
codegen_flags: <defaults>
</compile_context>

<pallas_src>
import functools

import jax
import jax.numpy as jnp
from jax.experimental import pallas as pl
from jax.experimental.pallas import tpu as pltpu

OUT_PAD = 128   # lane-dense padded width for the final (Bp, O) store
SUBLANE = 8     # sublane tile height


def _rnn_forward_kernel(
    x_ref,       # (S*Bp, I)   time-major, batch padded to a sublane multiple
    w_ih0_ref,   # (I, H)      = W_ih^T of layer 0
    w_hh0_ref,   # (H, H)      = W_hh^T of layer 0
    b0_ref,      # (1, H)      = b_ih0 + b_hh0
    w_ih1_ref,   # (H, H)      = W_ih^T of layer 1
    w_hh1_ref,   # (H, H)      = W_hh^T of layer 1
    b1_ref,      # (1, H)      = b_ih1 + b_hh1
    w_fc1_ref,   # (H, H//2)
    b_fc1_ref,   # (1, H//2)
    w_fc2_ref,   # (H//2, OUT_PAD)  zero-padded past column O
    b_fc2_ref,   # (1, OUT_PAD)     zero-padded past column O
    out_ref,     # (Bp, OUT_PAD)
    *,
    seq_len,
    batch,
):
    H = w_hh0_ref.shape[0]

    # Load recurrent weights once (reused every step).
    w_hh0 = w_hh0_ref[...]
    w_ih1 = w_ih1_ref[...]
    w_hh1 = w_hh1_ref[...]

    # --- Hoisted, batched layer-0 input projection (off the serial chain) ----
    # One (S*Bp, I) @ (I, H) matmul + one bias broadcast; time-major so the
    # per-step slice below is a zero-cost, sublane-aligned full-tile view.
    xp = jnp.dot(x_ref[...], w_ih0_ref[...], preferred_element_type=jnp.float32)
    xp = xp + b0_ref[...]                                   # (S*Bp, H), b0 folded once

    # --- Hoisted bias broadcast for layer 1 ----------------------------------
    b1_b = jnp.broadcast_to(b1_ref[...], (batch, H))

    h0 = jnp.zeros((batch, H), jnp.float32)
    h1 = jnp.zeros((batch, H), jnp.float32)

    # --- Fully unrolled recurrence (S static & small) ------------------------
    # Per step: the layer-1 recurrent matmul uses only h1[t-1], so it is off the
    # h0 critical path and overlaps layer-0's matmul+tanh. No concat/relayout.
    for t in range(seq_len):
        xp_t = xp[t * batch:(t + 1) * batch, :]             # free tile view (Bp, H)
        h1_rec = jnp.dot(h1, w_hh1, preferred_element_type=jnp.float32) + b1_b
        h0 = jnp.tanh(jnp.dot(h0, w_hh0, preferred_element_type=jnp.float32) + xp_t)
        h1 = jnp.tanh(jnp.dot(h0, w_ih1, preferred_element_type=jnp.float32) + h1_rec)

    # --- MLP head (dropout = identity at inference) --------------------------
    z = jnp.maximum(
        jnp.dot(h1, w_fc1_ref[...], preferred_element_type=jnp.float32)
        + b_fc1_ref[...],
        0.0,
    )
    y = jnp.dot(z, w_fc2_ref[...], preferred_element_type=jnp.float32) + b_fc2_ref[...]
    out_ref[...] = y.astype(out_ref.dtype)                  # lane-dense (Bp, 128) store


def prepare_params(params):
    """One-time weight plumbing, hoisted out of the per-call path:
    pad the head to a lane-dense 128-wide output (biases already pre-fused)."""
    H = params["w_hh0"].shape[0]
    O = params["w_fc2"].shape[1]
    prepped = dict(params)
    prepped["w_fc2_p"] = (
        jnp.zeros((H // 2, OUT_PAD), jnp.float32).at[:, :O].set(params["w_fc2"])
    )
    prepped["b_fc2_p"] = (
        jnp.zeros((1, OUT_PAD), jnp.float32).at[:, :O].set(params["b_fc2"])
    )
    return prepped


@jax.jit
def simple_rnn_forward(x, prepped):
    """x: (B, S, I) batch_first, float32. Returns (B, output_size)."""
    x = x.astype(jnp.float32)
    B, S, I = x.shape
    H = prepped["w_hh0"].shape[0]
    O = prepped["w_fc2"].shape[1]
    Bp = ((B + SUBLANE - 1) // SUBLANE) * SUBLANE

    # Wrapper-side layout plumbing (free under jit): time-major, sublane-padded,
    # flattened so the kernel does no reshapes/transposes of the input.
    x_t = jnp.transpose(x, (1, 0, 2))                        # (S, B, I)
    x_t = jnp.pad(x_t, ((0, 0), (0, Bp - B), (0, 0)))        # (S, Bp, I)
    x_flat = x_t.reshape(S * Bp, I)                          # (S*Bp, I)

    args = (
        x_flat,
        prepped["w_ih0"], prepped["w_hh0"], prepped["b0"],
        prepped["w_ih1"], prepped["w_hh1"], prepped["b1"],
        prepped["w_fc1"], prepped["b_fc1"],
        prepped["w_fc2_p"], prepped["b_fc2_p"],
    )

    # Rough cost model: pre-projection + 3 matmuls per recurrent step + head.
    flops = (
        2 * Bp * S * I * H
        + S * (3 * 2 * Bp * H * H)
        + 2 * Bp * H * (H // 2)
        + 2 * Bp * (H // 2) * OUT_PAD
    )
    transcendentals = 2 * S * Bp * H                         # tanh
    bytes_accessed = 4 * (sum(a.size for a in args) + Bp * OUT_PAD)

    kernel = functools.partial(_rnn_forward_kernel, seq_len=S, batch=Bp)
    vmem = pl.BlockSpec(memory_space=pltpu.MemorySpace.VMEM)
    out_padded = pl.pallas_call(
        kernel,
        out_shape=jax.ShapeDtypeStruct((Bp, OUT_PAD), jnp.float32),
        in_specs=[vmem] * len(args),
        out_specs=vmem,
        compiler_params=pltpu.CompilerParams(vmem_limit_bytes=32 * 1024 * 1024),
        cost_estimate=pl.CostEstimate(
            flops=flops,
            transcendentals=transcendentals,
            bytes_accessed=bytes_accessed,
        ),
    )(*args)
    # Fused output slice under jit (drop batch padding + head lane padding).
    return out_padded[:B, :O]


def init_params(key, input_size, hidden_size, output_size):
    """Deterministic PyTorch-style uniform(-1/sqrt(H), 1/sqrt(H)) init, pre-transposed."""
    ks = jax.random.split(key, 12)
    kH = 1.0 / jnp.sqrt(hidden_size)
    kF1 = 1.0 / jnp.sqrt(hidden_size)
    kF2 = 1.0 / jnp.sqrt(hidden_size // 2)
    u = lambda k, shape, s: jax.random.uniform(k, shape, jnp.float32, -s, s)
    params = {
        # layer 0: W_ih (H, I) stored transposed (I, H); W_hh stored transposed (H, H)
        "w_ih0": u(ks[0], (input_size, hidden_size), kH),
        "w_hh0": u(ks[1], (hidden_size, hidden_size), kH),
        "b0": u(ks[2], (1, hidden_size), kH) + u(ks[3], (1, hidden_size), kH),  # b_ih0+b_hh0
        # layer 1
        "w_ih1": u(ks[4], (hidden_size, hidden_size), kH),
        "w_hh1": u(ks[5], (hidden_size, hidden_size), kH),
        "b1": u(ks[6], (1, hidden_size), kH) + u(ks[7], (1, hidden_size), kH),
        # head
        "w_fc1": u(ks[8], (hidden_size, hidden_size // 2), kF1),
        "b_fc1": u(ks[9], (1, hidden_size // 2), kF1),
        "w_fc2": u(ks[10], (hidden_size // 2, output_size), kF2),
        "b_fc2": u(ks[11], (1, output_size), kF2),
    }
    return params


def reference_forward(x, p):
    """Pure-JAX reference of the same forward pass."""
    B, S, _ = x.shape
    H = p["w_hh0"].shape[0]
    h0 = jnp.zeros((B, H), jnp.float32)
    h1 = jnp.zeros((B, H), jnp.float32)
    for t in range(S):
        xt = x[:, t, :]
        h0 = jnp.tanh(xt @ p["w_ih0"] + h0 @ p["w_hh0"] + p["b0"])
        h1 = jnp.tanh(h0 @ p["w_ih1"] + h1 @ p["w_hh1"] + p["b1"])
    z = jnp.maximum(h1 @ p["w_fc1"] + p["b_fc1"], 0.0)
    return z @ p["w_fc2"] + p["b_fc2"]


if __name__ == "__main__":
    # Small shapes consistent with the module's forward:
    batch, seq_len = 4, 8
    input_size, hidden_size, num_layers, output_size = 8, 32, 2, 1

    key = jax.random.PRNGKey(0)
    k_x, k_p = jax.random.split(key)
    x = jax.random.normal(k_x, (batch, seq_len, input_size), jnp.float32)
    params = init_params(k_p, input_size, hidden_size, output_size)
    prepped = prepare_params(params)   # one-time, at parameter-load time

    out = simple_rnn_forward(x, prepped)
    out = jax.block_until_ready(out)

    ref = reference_forward(x, params)
    assert out.shape == (batch, output_size), out.shape
    assert jnp.allclose(out, ref, atol=1e-4, rtol=1e-4), (out, ref)
    print("KERNEL_OK")
</pallas_src>

<mosaic_0001>
module attributes {stable_mosaic.version = 11 : i64} {
  func.func @_rnn_forward_kernel(%arg0: memref<64x8xf32, #tpu.memory_space<vmem>>, %arg1: memref<8x32xf32, #tpu.memory_space<vmem>>, %arg2: memref<32x32xf32, #tpu.memory_space<vmem>>, %arg3: memref<1x32xf32, #tpu.memory_space<vmem>>, %arg4: memref<32x32xf32, #tpu.memory_space<vmem>>, %arg5: memref<32x32xf32, #tpu.memory_space<vmem>>, %arg6: memref<1x32xf32, #tpu.memory_space<vmem>>, %arg7: memref<32x16xf32, #tpu.memory_space<vmem>>, %arg8: memref<1x16xf32, #tpu.memory_space<vmem>>, %arg9: memref<16x128xf32, #tpu.memory_space<vmem>>, %arg10: memref<1x128xf32, #tpu.memory_space<vmem>>, %arg11: memref<8x128xf32, #tpu.memory_space<vmem>>) attributes {dimension_semantics = [], scalar_prefetch = 0 : i64, scratch_operands = 0 : i64, tpu.core_type = #tpu.core_type<tc>} {
    %c0 = arith.constant 0 : index
    %c0_0 = arith.constant 0 : index
    %0 = vector.load %arg2[%c0, %c0_0] : memref<32x32xf32, #tpu.memory_space<vmem>>, vector<32x32xf32>
    %c0_1 = arith.constant 0 : index
    %c0_2 = arith.constant 0 : index
    %1 = vector.load %arg4[%c0_1, %c0_2] : memref<32x32xf32, #tpu.memory_space<vmem>>, vector<32x32xf32>
    %c0_3 = arith.constant 0 : index
    %c0_4 = arith.constant 0 : index
    %2 = vector.load %arg5[%c0_3, %c0_4] : memref<32x32xf32, #tpu.memory_space<vmem>>, vector<32x32xf32>
    %c0_5 = arith.constant 0 : index
    %c0_6 = arith.constant 0 : index
    %3 = vector.load %arg0[%c0_5, %c0_6] : memref<64x8xf32, #tpu.memory_space<vmem>>, vector<64x8xf32>
    %c0_7 = arith.constant 0 : index
    %c0_8 = arith.constant 0 : index
    %4 = vector.load %arg1[%c0_7, %c0_8] : memref<8x32xf32, #tpu.memory_space<vmem>>, vector<8x32xf32>
    %cst = arith.constant dense<0.000000e+00> : vector<64x32xf32>
    %5 = tpu.matmul %3, %4, %cst {dimension_numbers = #tpu.dot_dimension_numbers<[1], [0], [0], [1], [0, 0, 1, 1], [], []>} : vector<64x8xf32>, vector<8x32xf32>, vector<64x32xf32> -> vector<64x32xf32>
    %c0_9 = arith.constant 0 : index
    %c0_10 = arith.constant 0 : index
    %6 = vector.load %arg3[%c0_9, %c0_10] : memref<1x32xf32, #tpu.memory_space<vmem>>, vector<1x32xf32>
    %7 = vector.broadcast %6 : vector<1x32xf32> to vector<64x32xf32>
    %8 = arith.addf %5, %7 : vector<64x32xf32>
    %c0_11 = arith.constant 0 : index
    %c0_12 = arith.constant 0 : index
    %9 = vector.load %arg6[%c0_11, %c0_12] : memref<1x32xf32, #tpu.memory_space<vmem>>, vector<1x32xf32>
    %10 = vector.shape_cast %9 : vector<1x32xf32> to vector<1x32xf32>
    %11 = vector.broadcast %10 : vector<1x32xf32> to vector<8x32xf32>
    %cst_13 = arith.constant 0.000000e+00 : f32
    %12 = vector.broadcast %cst_13 : f32 to vector<8x32xf32>
    %cst_14 = arith.constant 0.000000e+00 : f32
    %13 = vector.broadcast %cst_14 : f32 to vector<8x32xf32>
    %14 = vector.extract_strided_slice %8 {offsets = [0, 0], sizes = [8, 32], strides = [1, 1]} : vector<64x32xf32> to vector<8x32xf32>
    %cst_15 = arith.constant dense<0.000000e+00> : vector<8x32xf32>
    %15 = tpu.matmul %13, %2, %cst_15 {dimension_numbers = #tpu.dot_dimension_numbers<[1], [0], [0], [1], [0, 0, 1, 1], [], []>} : vector<8x32xf32>, vector<32x32xf32>, vector<8x32xf32> -> vector<8x32xf32>
    %16 = arith.addf %15, %11 : vector<8x32xf32>
    %cst_16 = arith.constant dense<0.000000e+00> : vector<8x32xf32>
    %17 = tpu.matmul %12, %0, %cst_16 {dimension_numbers = #tpu.dot_dimension_numbers<[1], [0], [0], [1], [0, 0, 1, 1], [], []>} : vector<8x32xf32>, vector<32x32xf32>, vector<8x32xf32> -> vector<8x32xf32>
    %18 = arith.addf %17, %14 : vector<8x32xf32>
    %19 = math.tanh %18 : vector<8x32xf32>
    %cst_17 = arith.constant dense<0.000000e+00> : vector<8x32xf32>
    %20 = tpu.matmul %19, %1, %cst_17 {dimension_numbers = #tpu.dot_dimension_numbers<[1], [0], [0], [1], [0, 0, 1, 1], [], []>} : vector<8x32xf32>, vector<32x32xf32>, vector<8x32xf32> -> vector<8x32xf32>
    %21 = arith.addf %20, %16 : vector<8x32xf32>
    %22 = math.tanh %21 : vector<8x32xf32>
    %23 = vector.extract_strided_slice %8 {offsets = [8, 0], sizes = [8, 32], strides = [1, 1]} : vector<64x32xf32> to vector<8x32xf32>
    %cst_18 = arith.constant dense<0.000000e+00> : vector<8x32xf32>
    %24 = tpu.matmul %22, %2, %cst_18 {dimension_numbers = #tpu.dot_dimension_numbers<[1], [0], [0], [1], [0, 0, 1, 1], [], []>} : vector<8x32xf32>, vector<32x32xf32>, vector<8x32xf32> -> vector<8x32xf32>
    %25 = arith.addf %24, %11 : vector<8x32xf32>
    %cst_19 = arith.constant dense<0.000000e+00> : vector<8x32xf32>
    %26 = tpu.matmul %19, %0, %cst_19 {dimension_numbers = #tpu.dot_dimension_numbers<[1], [0], [0], [1], [0, 0, 1, 1], [], []>} : vector<8x32xf32>, vector<32x32xf32>, vector<8x32xf32> -> vector<8x32xf32>
    %27 = arith.addf %26, %23 : vector<8x32xf32>
    %28 = math.tanh %27 : vector<8x32xf32>
    %cst_20 = arith.constant dense<0.000000e+00> : vector<8x32xf32>
    %29 = tpu.matmul %28, %1, %cst_20 {dimension_numbers = #tpu.dot_dimension_numbers<[1], [0], [0], [1], [0, 0, 1, 1], [], []>} : vector<8x32xf32>, vector<32x32xf32>, vector<8x32xf32> -> vector<8x32xf32>
    %30 = arith.addf %29, %25 : vector<8x32xf32>
    %31 = math.tanh %30 : vector<8x32xf32>
    %32 = vector.extract_strided_slice %8 {offsets = [16, 0], sizes = [8, 32], strides = [1, 1]} : vector<64x32xf32> to vector<8x32xf32>
    %cst_21 = arith.constant dense<0.000000e+00> : vector<8x32xf32>
    %33 = tpu.matmul %31, %2, %cst_21 {dimension_numbers = #tpu.dot_dimension_numbers<[1], [0], [0], [1], [0, 0, 1, 1], [], []>} : vector<8x32xf32>, vector<32x32xf32>, vector<8x32xf32> -> vector<8x32xf32>
    %34 = arith.addf %33, %11 : vector<8x32xf32>
    %cst_22 = arith.constant dense<0.000000e+00> : vector<8x32xf32>
    %35 = tpu.matmul %28, %0, %cst_22 {dimension_numbers = #tpu.dot_dimension_numbers<[1], [0], [0], [1], [0, 0, 1, 1], [], []>} : vector<8x32xf32>, vector<32x32xf32>, vector<8x32xf32> -> vector<8x32xf32>
    %36 = arith.addf %35, %32 : vector<8x32xf32>
    %37 = math.tanh %36 : vector<8x32xf32>
    %cst_23 = arith.constant dense<0.000000e+00> : vector<8x32xf32>
    %38 = tpu.matmul %37, %1, %cst_23 {dimension_numbers = #tpu.dot_dimension_numbers<[1], [0], [0], [1], [0, 0, 1, 1], [], []>} : vector<8x32xf32>, vector<32x32xf32>, vector<8x32xf32> -> vector<8x32xf32>
    %39 = arith.addf %38, %34 : vector<8x32xf32>
    %40 = math.tanh %39 : vector<8x32xf32>
    %41 = vector.extract_strided_slice %8 {offsets = [24, 0], sizes = [8, 32], strides = [1, 1]} : vector<64x32xf32> to vector<8x32xf32>
    %cst_24 = arith.constant dense<0.000000e+00> : vector<8x32xf32>
    %42 = tpu.matmul %40, %2, %cst_24 {dimension_numbers = #tpu.dot_dimension_numbers<[1], [0], [0], [1], [0, 0, 1, 1], [], []>} : vector<8x32xf32>, vector<32x32xf32>, vector<8x32xf32> -> vector<8x32xf32>
    %43 = arith.addf %42, %11 : vector<8x32xf32>
    %cst_25 = arith.constant dense<0.000000e+00> : vector<8x32xf32>
    %44 = tpu.matmul %37, %0, %cst_25 {dimension_numbers = #tpu.dot_dimension_numbers<[1], [0], [0], [1], [0, 0, 1, 1], [], []>} : vector<8x32xf32>, vector<32x32xf32>, vector<8x32xf32> -> vector<8x32xf32>
    %45 = arith.addf %44, %41 : vector<8x32xf32>
    %46 = math.tanh %45 : vector<8x32xf32>
    %cst_26 = arith.constant dense<0.000000e+00> : vector<8x32xf32>
    %47 = tpu.matmul %46, %1, %cst_26 {dimension_numbers = #tpu.dot_dimension_numbers<[1], [0], [0], [1], [0, 0, 1, 1], [], []>} : vector<8x32xf32>, vector<32x32xf32>, vector<8x32xf32> -> vector<8x32xf32>
    %48 = arith.addf %47, %43 : vector<8x32xf32>
    %49 = math.tanh %48 : vector<8x32xf32>
    %50 = vector.extract_strided_slice %8 {offsets = [32, 0], sizes = [8, 32], strides = [1, 1]} : vector<64x32xf32> to vector<8x32xf32>
    %cst_27 = arith.constant dense<0.000000e+00> : vector<8x32xf32>
    %51 = tpu.matmul %49, %2, %cst_27 {dimension_numbers = #tpu.dot_dimension_numbers<[1], [0], [0], [1], [0, 0, 1, 1], [], []>} : vector<8x32xf32>, vector<32x32xf32>, vector<8x32xf32> -> vector<8x32xf32>
    %52 = arith.addf %51, %11 : vector<8x32xf32>
    %cst_28 = arith.constant dense<0.000000e+00> : vector<8x32xf32>
    %53 = tpu.matmul %46, %0, %cst_28 {dimension_numbers = #tpu.dot_dimension_numbers<[1], [0], [0], [1], [0, 0, 1, 1], [], []>} : vector<8x32xf32>, vector<32x32xf32>, vector<8x32xf32> -> vector<8x32xf32>
    %54 = arith.addf %53, %50 : vector<8x32xf32>
    %55 = math.tanh %54 : vector<8x32xf32>
    %cst_29 = arith.constant dense<0.000000e+00> : vector<8x32xf32>
    %56 = tpu.matmul %55, %1, %cst_29 {dimension_numbers = #tpu.dot_dimension_numbers<[1], [0], [0], [1], [0, 0, 1, 1], [], []>} : vector<8x32xf32>, vector<32x32xf32>, vector<8x32xf32> -> vector<8x32xf32>
    %57 = arith.addf %56, %52 : vector<8x32xf32>
    %58 = math.tanh %57 : vector<8x32xf32>
    %59 = vector.extract_strided_slice %8 {offsets = [40, 0], sizes = [8, 32], strides = [1, 1]} : vector<64x32xf32> to vector<8x32xf32>
    %cst_30 = arith.constant dense<0.000000e+00> : vector<8x32xf32>
    %60 = tpu.matmul %58, %2, %cst_30 {dimension_numbers = #tpu.dot_dimension_numbers<[1], [0], [0], [1], [0, 0, 1, 1], [], []>} : vector<8x32xf32>, vector<32x32xf32>, vector<8x32xf32> -> vector<8x32xf32>
    %61 = arith.addf %60, %11 : vector<8x32xf32>
    %cst_31 = arith.constant dense<0.000000e+00> : vector<8x32xf32>
    %62 = tpu.matmul %55, %0, %cst_31 {dimension_numbers = #tpu.dot_dimension_numbers<[1], [0], [0], [1], [0, 0, 1, 1], [], []>} : vector<8x32xf32>, vector<32x32xf32>, vector<8x32xf32> -> vector<8x32xf32>
    %63 = arith.addf %62, %59 : vector<8x32xf32>
    %64 = math.tanh %63 : vector<8x32xf32>
    %cst_32 = arith.constant dense<0.000000e+00> : vector<8x32xf32>
    %65 = tpu.matmul %64, %1, %cst_32 {dimension_numbers = #tpu.dot_dimension_numbers<[1], [0], [0], [1], [0, 0, 1, 1], [], []>} : vector<8x32xf32>, vector<32x32xf32>, vector<8x32xf32> -> vector<8x32xf32>
    %66 = arith.addf %65, %61 : vector<8x32xf32>
    %67 = math.tanh %66 : vector<8x32xf32>
    %68 = vector.extract_strided_slice %8 {offsets = [48, 0], sizes = [8, 32], strides = [1, 1]} : vector<64x32xf32> to vector<8x32xf32>
    %cst_33 = arith.constant dense<0.000000e+00> : vector<8x32xf32>
    %69 = tpu.matmul %67, %2, %cst_33 {dimension_numbers = #tpu.dot_dimension_numbers<[1], [0], [0], [1], [0, 0, 1, 1], [], []>} : vector<8x32xf32>, vector<32x32xf32>, vector<8x32xf32> -> vector<8x32xf32>
    %70 = arith.addf %69, %11 : vector<8x32xf32>
    %cst_34 = arith.constant dense<0.000000e+00> : vector<8x32xf32>
    %71 = tpu.matmul %64, %0, %cst_34 {dimension_numbers = #tpu.dot_dimension_numbers<[1], [0], [0], [1], [0, 0, 1, 1], [], []>} : vector<8x32xf32>, vector<32x32xf32>, vector<8x32xf32> -> vector<8x32xf32>
    %72 = arith.addf %71, %68 : vector<8x32xf32>
    %73 = math.tanh %72 : vector<8x32xf32>
    %cst_35 = arith.constant dense<0.000000e+00> : vector<8x32xf32>
    %74 = tpu.matmul %73, %1, %cst_35 {dimension_numbers = #tpu.dot_dimension_numbers<[1], [0], [0], [1], [0, 0, 1, 1], [], []>} : vector<8x32xf32>, vector<32x32xf32>, vector<8x32xf32> -> vector<8x32xf32>
    %75 = arith.addf %74, %70 : vector<8x32xf32>
    %76 = math.tanh %75 : vector<8x32xf32>
    %77 = vector.extract_strided_slice %8 {offsets = [56, 0], sizes = [8, 32], strides = [1, 1]} : vector<64x32xf32> to vector<8x32xf32>
    %cst_36 = arith.constant dense<0.000000e+00> : vector<8x32xf32>
    %78 = tpu.matmul %76, %2, %cst_36 {dimension_numbers = #tpu.dot_dimension_numbers<[1], [0], [0], [1], [0, 0, 1, 1], [], []>} : vector<8x32xf32>, vector<32x32xf32>, vector<8x32xf32> -> vector<8x32xf32>
    %79 = arith.addf %78, %11 : vector<8x32xf32>
    %cst_37 = arith.constant dense<0.000000e+00> : vector<8x32xf32>
    %80 = tpu.matmul %73, %0, %cst_37 {dimension_numbers = #tpu.dot_dimension_numbers<[1], [0], [0], [1], [0, 0, 1, 1], [], []>} : vector<8x32xf32>, vector<32x32xf32>, vector<8x32xf32> -> vector<8x32xf32>
    %81 = arith.addf %80, %77 : vector<8x32xf32>
    %82 = math.tanh %81 : vector<8x32xf32>
    %cst_38 = arith.constant dense<0.000000e+00> : vector<8x32xf32>
    %83 = tpu.matmul %82, %1, %cst_38 {dimension_numbers = #tpu.dot_dimension_numbers<[1], [0], [0], [1], [0, 0, 1, 1], [], []>} : vector<8x32xf32>, vector<32x32xf32>, vector<8x32xf32> -> vector<8x32xf32>
    %84 = arith.addf %83, %79 : vector<8x32xf32>
    %85 = math.tanh %84 : vector<8x32xf32>
    %c0_39 = arith.constant 0 : index
    %c0_40 = arith.constant 0 : index
    %86 = vector.load %arg7[%c0_39, %c0_40] : memref<32x16xf32, #tpu.memory_space<vmem>>, vector<32x16xf32>
    %cst_41 = arith.constant dense<0.000000e+00> : vector<8x16xf32>
    %87 = tpu.matmul %85, %86, %cst_41 {dimension_numbers = #tpu.dot_dimension_numbers<[1], [0], [0], [1], [0, 0, 1, 1], [], []>} : vector<8x32xf32>, vector<32x16xf32>, vector<8x16xf32> -> vector<8x16xf32>
    %c0_42 = arith.constant 0 : index
    %c0_43 = arith.constant 0 : index
    %88 = vector.load %arg8[%c0_42, %c0_43] : memref<1x16xf32, #tpu.memory_space<vmem>>, vector<1x16xf32>
    %89 = vector.broadcast %88 : vector<1x16xf32> to vector<8x16xf32>
    %90 = arith.addf %87, %89 : vector<8x16xf32>
    %cst_44 = arith.constant 0.000000e+00 : f32
    %91 = vector.broadcast %cst_44 : f32 to vector<8x16xf32>
    %92 = arith.maximumf %90, %91 : vector<8x16xf32>
    %c0_45 = arith.constant 0 : index
    %c0_46 = arith.constant 0 : index
    %93 = vector.load %arg9[%c0_45, %c0_46] : memref<16x128xf32, #tpu.memory_space<vmem>>, vector<16x128xf32>
    %cst_47 = arith.constant dense<0.000000e+00> : vector<8x128xf32>
    %94 = tpu.matmul %92, %93, %cst_47 {dimension_numbers = #tpu.dot_dimension_numbers<[1], [0], [0], [1], [0, 0, 1, 1], [], []>} : vector<8x16xf32>, vector<16x128xf32>, vector<8x128xf32> -> vector<8x128xf32>
    %c0_48 = arith.constant 0 : index
    %c0_49 = arith.constant 0 : index
    %95 = vector.load %arg10[%c0_48, %c0_49] : memref<1x128xf32, #tpu.memory_space<vmem>>, vector<1x128xf32>
    %96 = vector.broadcast %95 : vector<1x128xf32> to vector<8x128xf32>
    %97 = arith.addf %94, %96 : vector<8x128xf32>
    %c0_50 = arith.constant 0 : index
    %c0_51 = arith.constant 0 : index
    %98 = vector.load %arg11[%c0_50, %c0_51] : memref<8x128xf32, #tpu.memory_space<vmem>>, vector<8x128xf32>
    tpu.vector_store %arg11[%c0_50, %c0_51], %97 {strides = array<i32>} : memref<8x128xf32, #tpu.memory_space<vmem>>, vector<8x128xf32>,
    return
  }
}

</mosaic_0001>

<bundles_post_ra>
// kernel: simple_rnn_forward.1
= control target key start
LH: loop header
LB: loop body
LE: loop exit
PB: predicated region body
PF: predicated region fallthrough
CT: control target
= control target key end

     0   :  { %v2802_v0 = vmov 0.0|0.0   ;;  %vm2803_vm0 = vmmov 0   ;;  %v2804_v4 = vmov 0.0   ;;  %vm66_vm1 = vcmask 64512   ;;  %s3192_s5 = inlined_call_operand.vmem [shape: f32[32,32], index: 5, kind: input, shape index: {}]   ;;  %s3193_s1 = inlined_call_operand.vmem [shape: f32[8,32], index: 1, kind: input, shape index: {}]   ;;  %s3194_s0 = inlined_call_operand.vmem [shape: f32[64,8], index: 0, kind: input, shape index: {}]   ;;  %s3195_s2 = inlined_call_operand.vmem [shape: f32[32,32], index: 2, kind: input, shape index: {}]   ;;  %s3196_s4 = inlined_call_operand.vmem [shape: f32[32,32], index: 4, kind: input, shape index: {}]   ;;  %s3197_s3 = inlined_call_operand.vmem [shape: f32[1,32], index: 3, kind: input, shape index: {}]   ;;  %s3198_s6 = inlined_call_operand.vmem [shape: f32[1,32], index: 6, kind: input, shape index: {}]   ;;  %s3199_s7 = inlined_call_operand.vmem [shape: f32[32,16], index: 7, kind: input, shape index: {}]   ;;  %s3200_s9 = inlined_call_operand.vmem [shape: f32[16,128], index: 9, kind: input, shape index: {}]   ;;  %s3201_s8 = inlined_call_operand.vmem [shape: f32[1,16], index: 8, kind: input, shape index: {}]   ;;  %s3202_s10 = inlined_call_operand.vmem [shape: f32[1,128], index: 10, kind: input, shape index: {}]   ;;  %s3203_s11 = inlined_call_operand.vmem [shape: f32[8,128], index: 11, kind: output, shape index: {}]  }
   0x1   :  { %2590 = vmatprep.subr.bf16.mxu1 %v2802_v0  ;;  %v46_v1 = vld [vmem:[%s3192_s5] sm:$0xff]  ;;  %v47_v2 = vld [vmem:[%s3192_s5 + $0x8] sm:$0xff]  ;;  %v48_v3 = vld [vmem:[%s3192_s5 + $0x10] sm:$0xff]  ;;  %2316 = vmatprep.mubr.msk.f32.mxu1 %vm2803_vm0, %v2804_v4  ;;  %vm203_vm2 = vcmask 261120   ;;  %vm2042_vm3 = vcmask 130048  }
   0x2   :  { %v2877_v5 = vpack.c.bf16 %v47_v2, %v46_v1  ;;  %v49_v6 = vld [vmem:[%s3192_s5 + $0x18] sm:$0xff]  ;;  %v58_v7 = vld [vmem:[%s3193_s1] sm:$0xff]  ;;  %v51_v10 = vld [vmem:[%s3194_s0 + $0x8] sm:$0xff] }
   0x3   :  { %v50_v8 = vld [vmem:[%s3194_s0] sm:$0xff]  ;;  %v2889_v9 = vpack.c.bf16 %v49_v6, %v48_v3  ;;  %2294 = vmatprep.subr.mxu0 %v58_v7  ;;  %v39_v12 = vld [vmem:[%s3195_s2 + $0x8] sm:$0xff]  ;;  %v40_v14 = vld [vmem:[%s3195_s2 + $0x10] sm:$0xff] }
   0x4   :  { %2592 = vmatpush3.bf16.msra.mxu1 %v2877_v5  ;;  %v38_v11 = vld [vmem:[%s3195_s2] sm:$0xff]  ;;  %2295 = vmatpush3.msra.mxu0 %v58_v7  ;;  %v41_v15 = vld [vmem:[%s3195_s2 + $0x18] sm:$0xff]  ;;  %v43_v18 = vld [vmem:[%s3196_s4 + $0x8] sm:$0xff] }
   0x5   :  { %2593 = vmatprep.subr.bf16.mxu1 %v2802_v0  ;;  %2296 = vmatprep.mubr.msk.f32.mxu0 %vm66_vm1, %v50_v8  ;;  %v2905_v13 = vpack.c.bf16 %v39_v12, %v38_v11  ;;  %v2918_v16 = vpack.c.bf16 %v41_v15, %v40_v14  ;;  %v42_v17 = vld [vmem:[%s3196_s4] sm:$0xff]  ;;  %v44_v19 = vld [vmem:[%s3196_s4 + $0x10] sm:$0xff]  ;;  %v45_v21 = vld [vmem:[%s3196_s4 + $0x18] sm:$0xff] }
   0x6   :  { %2608 = vmatprep.subr.bf16.mxu0 %v2802_v0  ;;  %2297 = vmatmul.mubr.msk.f32.vlgmr.msra.gmra.mrb[0].mxu0 %vm66_vm1, %v51_v10  ;;  %v2939_v20 = vpack.c.bf16 %v43_v18, %v42_v17  ;;  %v2945_v22 = vpack.c.bf16 %v45_v21, %v44_v19  ;;  %v52_v23 = vld [vmem:[%s3194_s0 + $0x10] sm:$0xff]  ;;  %v2957_v26 = vld [vmem:[%s3197_s3] ss:$0 sm:$0xff]  ;;  %v53_v32 = vld [vmem:[%s3194_s0 + $0x18] sm:$0xff] }
   0x7   :  { %2610 = vmatpush3.bf16.msra.mxu0 %v2877_v5  ;;  %2299 = vmatprep.mubr.msk.f32.mxu0 %vm66_vm1, %v52_v23  ;;  %v54_v33 = vld [vmem:[%s3194_s0 + $0x20] sm:$0xff]  ;;  %v55_v34 = vld [vmem:[%s3194_s0 + $0x28] sm:$0xff]  ;;  %v56_v35 = vld [vmem:[%s3194_s0 + $0x30] sm:$0xff] }
   0x8   :  { %2595 = vmatpush3.bf16.msra.mxu1 %v2889_v9  ;;  %2611 = vmatprep.subr.bf16.mxu0 %v2802_v0  ;;  %v57_v36 = vld [vmem:[%s3194_s0 + $0x38] sm:$0xff]  ;;  %v2992_v37 = vld [vmem:[%s3198_s6] ss:$0 sm:$0xff] }
   0x9   :  { %2596 = vmatprep.subr.bf16.mxu1 %v2802_v0 }
   0xa   :  { %2300 = vmatmul.mubr.msk.f32.gmra.mrb[2].mxu0 %vm66_vm1, %v53_v32 }
   0xb   :  { %2317 = vmatmul.mubr.f32.vlgmr.msra.gmra.mrb[0].mxu1 %v2804_v4  ;;  %2613 = vmatpush3.bf16.msra.mxu0 %v2889_v9 }
   0xc   :  { %2598 = vmatpush3.bf16.msra.mxu1 %v2905_v13  ;;  %2327 = vmatprep.mubr.msk.f32.mxu1 %vm2803_vm0, %v2804_v4 }
   0xd   :  { %2599 = vmatprep.subr.bf16.mxu1 %v2802_v0  ;;  %2614 = vmatprep.subr.bf16.mxu0 %v2802_v0 }
   0xe   :  { %2302 = vmatprep.mubr.msk.f32.mxu0 %vm66_vm1, %v54_v33 }
   0xf   :  { %2303 = vmatmul.mubr.msk.f32.gmra.mrb[4].mxu0 %vm66_vm1, %v55_v34 }
  0x10   :  { %2601 = vmatpush3.bf16.msra.mxu1 %v2918_v16  ;;  %2305 = vmatprep.mubr.msk.f32.mxu0 %vm66_vm1, %v56_v35 }
  0x11   :  { %2602 = vmatprep.subr.bf16.mxu1 %v2802_v0 }
  0x13   :  { %2328 = vmatmul.mubr.f32.vlgmr.msra.gmra.mrb[2].mxu1 %v2804_v4  ;;  %2306 = vmatmul.mubr.msk.f32.gmra.mrb[6].mxu0 %vm66_vm1, %v57_v36 }
  0x14   :  { %2338 = vmatprep.mubr.msk.f32.mxu1 %vm2803_vm0, %v2804_v4  ;;  %2604 = vmatpush3.bf16.msra.mxu1 %v2939_v20 }
  0x15   :  { %2605 = vmatprep.subr.bf16.mxu1 %v2802_v0  ;;  %2349 = vmatprep.mubr.msk.f32.mxu0 %vm2803_vm0, %v2804_v4 }
  0x18   :  { %2607 = vmatpush3.bf16.msra.mxu1 %v2945_v22 }
  0x19   :  { %2626 = vmatprep.subr.bf16.mxu1 %v2802_v0 }
  0xd9   :  { %v2298_v24 = vpop.f32.mrb[0].mxu0 }
  0xda   :  { %v157_v25 = vpop.f32.mrb[1].mxu0  ;;  %v163_v48 = vadd.f32 %v2298_v24, %v2957_v26 }
  0xdb   :  { %v158_v27 = vadd.f32 %v2957_v26, %v157_v25 }
  0xdd   :  { %v3009_v42 = vpop.f32.mrb[2].mxu0 }
  0xde   :  { %v167_v43 = vpop.f32.mrb[3].mxu0  ;;  %v173_v3 = vadd.f32 %v3009_v42, %v2957_v26 }
  0xdf   :  { %v168_v57 = vadd.f32 %v2957_v26, %v167_v43 }
  0xe2   :  { %v3011_v44 = vpop.f32.mrb[4].mxu0 }
  0xe3   :  { %v3013_v45 = vpop.f32.mrb[5].mxu0 }
  0xe4   :  { %v178_v17 = vadd.f32 %v2957_v26, %v3013_v45 }
  0xe6   :  { %v343_v28 = vpop.f32.mrb[2].mxu1  ;;  %v3015_v46 = vpop.f32.mrb[6].mxu0 }
  0xe7   :  { %v344_v29 = vadd.f32 %v343_v28, %v158_v27  ;;  %v2329_v30 = vpop.f32.mrb[3].mxu1  ;;  %v3017_v47 = vpop.f32.mrb[7].mxu0 }
  0xe9   :  { %2770 = vtanh.f32 %v344_v29  ;;  %v183_v29 = vadd.f32 %v3011_v44, %v2957_v26 }
  0xf3   :  { %v2771_v31 = vpop.eup %2770 }
  0xf4   :  { %2339 = vmatmul.mubr.msk.f32.vlgmr.msra.gmra.mrb[0].mxu1 %vm203_vm2, %v2771_v31 }
  0xf5   :  { %2628 = vmatpush3.bf16.msra.mxu1 %v2877_v5  ;;  %2382 = vmatprep.mubr.msk.f32.mxu1 %vm2803_vm0, %v2804_v4 }
  0xf6   :  { %2629 = vmatprep.subr.bf16.mxu1 %v2802_v0 }
  0xf9   :  { %2631 = vmatpush3.bf16.msra.mxu1 %v2889_v9 }
  0xfa   :  { %2632 = vmatprep.subr.bf16.mxu1 %v2802_v0 }
 0x1c7   :  { %v417_v38 = vpop.f32.mrb[0].mxu1 }
 0x1c8   :  { %v2743_v39 = vadd.f32 %v2992_v37, %v417_v38  ;;  %v2340_v40 = vpop.f32.mrb[1].mxu1 }
 0x1ca   :  { %2772 = vtanh.f32 %v2743_v39 }
 0x1d4   :  { %v2773_v41 = vpop.eup %2772 }
 0x1d5   :  { %2350 = vmatmul.mubr.msk.f32.vlgmr.msra.gmra.mrb[8].mxu0 %vm203_vm2, %v2773_v41 }
 0x1d6   :  { %2616 = vmatpush3.bf16.msra.mxu0 %v2905_v13  ;;  %2360 = vmatprep.mubr.msk.f32.mxu0 %vm2803_vm0, %v2804_v4 }
 0x1d7   :  { %2617 = vmatprep.subr.bf16.mxu0 %v2802_v0 }
 0x1da   :  { %2619 = vmatpush3.bf16.msra.mxu0 %v2918_v16 }
 0x1db   :  { %2620 = vmatprep.subr.bf16.mxu0 %v2802_v0 }
 0x1dd   :  { %2361 = vmatmul.mubr.msk.f32.vlgmr.msra.gmra.mrb[10].mxu0 %vm203_vm2, %v2771_v31 }
 0x1de   :  { %2622 = vmatpush3.bf16.msra.mxu0 %v2939_v20  ;;  %2371 = vmatprep.mubr.msk.f32.mxu0 %vm2803_vm0, %v2804_v4 }
 0x1df   :  { %2623 = vmatprep.subr.bf16.mxu0 %v2802_v0 }
 0x1e2   :  { %2625 = vmatpush3.bf16.msra.mxu0 %v2945_v22 }
 0x1e3   :  { %2644 = vmatprep.subr.bf16.mxu0 %v2802_v0 }
 0x2b0   :  { %v561_v49 = vpop.f32.mrb[10].mxu0 }
 0x2b1   :  { %v562_v50 = vadd.f32 %v561_v49, %v163_v48  ;;  %v2362_v51 = vpop.f32.mrb[11].mxu0 }
 0x2b3   :  { %2774 = vtanh.f32 %v562_v50  ;;  %v1949_v50 = vld [vmem:[%s3199_s7 + $0x8] sm:$0xff] }
 0x2bd   :  { %v2775_v52 = vpop.eup %2774 }
 0x2be   :  { %2372 = vmatmul.mubr.msk.f32.vlgmr.msra.gmra.mrb[8].mxu0 %vm203_vm2, %v2775_v52 }
 0x2bf   :  { %2646 = vmatpush3.bf16.msra.mxu0 %v2877_v5  ;;  %2415 = vmatprep.mubr.msk.f32.mxu0 %vm2803_vm0, %v2804_v4 }
 0x2c0   :  { %2647 = vmatprep.subr.bf16.mxu0 %v2802_v0 }
 0x2c3   :  { %2649 = vmatpush3.bf16.msra.mxu0 %v2889_v9 }
 0x2c4   :  { %2650 = vmatprep.subr.bf16.mxu0 %v2802_v0 }
 0x391   :  { %v635_v53 = vpop.f32.mrb[8].mxu0 }
 0x392   :  { %v2744_v54 = vadd.f32 %v2992_v37, %v635_v53  ;;  %v2373_v55 = vpop.f32.mrb[9].mxu0 }
 0x394   :  { %2776 = vtanh.f32 %v2744_v54 }
 0x39e   :  { %v2777_v56 = vpop.eup %2776 }
 0x39f   :  { %2383 = vmatmul.mubr.msk.f32.vlgmr.msra.gmra.mrb[4].mxu1 %vm203_vm2, %v2777_v56  ;;  %v2033_v56 = vld [vmem:[%s3200_s9] sm:$0xff] }
 0x3a0   :  { %2634 = vmatpush3.bf16.msra.mxu1 %v2905_v13  ;;  %2393 = vmatprep.mubr.msk.f32.mxu1 %vm2803_vm0, %v2804_v4 }
 0x3a1   :  { %2635 = vmatprep.subr.bf16.mxu1 %v2802_v0 }
 0x3a4   :  { %2637 = vmatpush3.bf16.msra.mxu1 %v2918_v16 }
 0x3a5   :  { %2638 = vmatprep.subr.bf16.mxu1 %v2802_v0 }
 0x3a7   :  { %2394 = vmatmul.mubr.msk.f32.vlgmr.msra.gmra.mrb[6].mxu1 %vm203_vm2, %v2775_v52 }
 0x3a8   :  { %2640 = vmatpush3.bf16.msra.mxu1 %v2939_v20  ;;  %2404 = vmatprep.mubr.msk.f32.mxu1 %vm2803_vm0, %v2804_v4 }
 0x3a9   :  { %2641 = vmatprep.subr.bf16.mxu1 %v2802_v0 }
 0x3ac   :  { %2643 = vmatpush3.bf16.msra.mxu1 %v2945_v22 }
 0x3ad   :  { %2662 = vmatprep.subr.bf16.mxu1 %v2802_v0 }
 0x47a   :  { %v779_v58 = vpop.f32.mrb[6].mxu1 }
 0x47b   :  { %v780_v59 = vadd.f32 %v779_v58, %v168_v57  ;;  %v2395_v60 = vpop.f32.mrb[7].mxu1  ;;  %v2034_v57 = vld [vmem:[%s3200_s9 + $0x8] sm:$0xff] }
 0x47d   :  { %2778 = vtanh.f32 %v780_v59 }
 0x487   :  { %v2779_v61 = vpop.eup %2778 }
 0x488   :  { %2405 = vmatmul.mubr.msk.f32.vlgmr.msra.gmra.mrb[4].mxu1 %vm203_vm2, %v2779_v61 }
 0x489   :  { %2664 = vmatpush3.bf16.msra.mxu1 %v2877_v5  ;;  %2448 = vmatprep.mubr.msk.f32.mxu1 %vm2803_vm0, %v2804_v4 }
 0x48a   :  { %2665 = vmatprep.subr.bf16.mxu1 %v2802_v0 }
 0x48d   :  { %2667 = vmatpush3.bf16.msra.mxu1 %v2889_v9 }
 0x48e   :  { %2668 = vmatprep.subr.bf16.mxu1 %v2802_v0 }
 0x55b   :  { %v853_v62 = vpop.f32.mrb[4].mxu1 }
 0x55c   :  { %v2745_v63 = vadd.f32 %v2992_v37, %v853_v62  ;;  %v2406_v1 = vpop.f32.mrb[5].mxu1 }
 0x55e   :  { %2780 = vtanh.f32 %v2745_v63 }
 0x568   :  { %v2781_v2 = vpop.eup %2780 }
 0x569   :  { %2416 = vmatmul.mubr.msk.f32.vlgmr.msra.gmra.mrb[12].mxu0 %vm203_vm2, %v2781_v2 }
 0x56a   :  { %2652 = vmatpush3.bf16.msra.mxu0 %v2905_v13  ;;  %2426 = vmatprep.mubr.msk.f32.mxu0 %vm2803_vm0, %v2804_v4 }
 0x56b   :  { %2653 = vmatprep.subr.bf16.mxu0 %v2802_v0 }
 0x56e   :  { %2655 = vmatpush3.bf16.msra.mxu0 %v2918_v16 }
 0x56f   :  { %2656 = vmatprep.subr.bf16.mxu0 %v2802_v0 }
 0x571   :  { %2427 = vmatmul.mubr.msk.f32.vlgmr.msra.gmra.mrb[14].mxu0 %vm203_vm2, %v2779_v61 }
 0x572   :  { %2658 = vmatpush3.bf16.msra.mxu0 %v2939_v20  ;;  %2437 = vmatprep.mubr.msk.f32.mxu0 %vm2803_vm0, %v2804_v4 }
 0x573   :  { %2659 = vmatprep.subr.bf16.mxu0 %v2802_v0 }
 0x576   :  { %2661 = vmatpush3.bf16.msra.mxu0 %v2945_v22 }
 0x577   :  { %2680 = vmatprep.subr.bf16.mxu0 %v2802_v0 }
 0x644   :  { %v997_v6 = vpop.f32.mrb[14].mxu0 }
 0x645   :  { %v998_v7 = vadd.f32 %v997_v6, %v173_v3  ;;  %v2428_v8 = vpop.f32.mrb[15].mxu0 }
 0x647   :  { %2782 = vtanh.f32 %v998_v7 }
 0x651   :  { %v2783_v10 = vpop.eup %2782 }
 0x652   :  { %2438 = vmatmul.mubr.msk.f32.vlgmr.msra.gmra.mrb[12].mxu0 %vm203_vm2, %v2783_v10 }
 0x653   :  { %2682 = vmatpush3.bf16.msra.mxu0 %v2877_v5  ;;  %2481 = vmatprep.mubr.msk.f32.mxu0 %vm2803_vm0, %v2804_v4 }
 0x654   :  { %2683 = vmatprep.subr.bf16.mxu0 %v2802_v0 }
 0x657   :  { %2685 = vmatpush3.bf16.msra.mxu0 %v2889_v9 }
 0x658   :  { %2686 = vmatprep.subr.bf16.mxu0 %v2802_v0 }
 0x725   :  { %v1071_v11 = vpop.f32.mrb[12].mxu0 }
 0x726   :  { %v2746_v12 = vadd.f32 %v2992_v37, %v1071_v11  ;;  %v2439_v14 = vpop.f32.mrb[13].mxu0 }
 0x728   :  { %2784 = vtanh.f32 %v2746_v12 }
 0x732   :  { %v2785_v15 = vpop.eup %2784 }
 0x733   :  { %2449 = vmatmul.mubr.msk.f32.vlgmr.msra.gmra.mrb[8].mxu1 %vm203_vm2, %v2785_v15 }
 0x734   :  { %2670 = vmatpush3.bf16.msra.mxu1 %v2905_v13  ;;  %2459 = vmatprep.mubr.msk.f32.mxu1 %vm2803_vm0, %v2804_v4 }
 0x735   :  { %2671 = vmatprep.subr.bf16.mxu1 %v2802_v0 }
 0x738   :  { %2673 = vmatpush3.bf16.msra.mxu1 %v2918_v16 }
 0x739   :  { %2674 = vmatprep.subr.bf16.mxu1 %v2802_v0 }
 0x73b   :  { %2460 = vmatmul.mubr.msk.f32.vlgmr.msra.gmra.mrb[10].mxu1 %vm203_vm2, %v2783_v10 }
 0x73c   :  { %2676 = vmatpush3.bf16.msra.mxu1 %v2939_v20  ;;  %2470 = vmatprep.mubr.msk.f32.mxu1 %vm2803_vm0, %v2804_v4 }
 0x73d   :  { %2677 = vmatprep.subr.bf16.mxu1 %v2802_v0 }
 0x740   :  { %2679 = vmatpush3.bf16.msra.mxu1 %v2945_v22 }
 0x741   :  { %2698 = vmatprep.subr.bf16.mxu1 %v2802_v0 }
 0x80e   :  { %v1215_v18 = vpop.f32.mrb[10].mxu1 }
 0x80f   :  { %v1216_v19 = vadd.f32 %v1215_v18, %v178_v17  ;;  %v2461_v21 = vpop.f32.mrb[11].mxu1 }
 0x811   :  { %2786 = vtanh.f32 %v1216_v19 }
 0x81b   :  { %v2787_v23 = vpop.eup %2786 }
 0x81c   :  { %2471 = vmatmul.mubr.msk.f32.vlgmr.msra.gmra.mrb[8].mxu1 %vm203_vm2, %v2787_v23 }
 0x81d   :  { %2700 = vmatpush3.bf16.msra.mxu1 %v2877_v5  ;;  %2514 = vmatprep.mubr.msk.f32.mxu1 %vm2803_vm0, %v2804_v4 }
 0x81e   :  { %2701 = vmatprep.subr.bf16.mxu1 %v2802_v0 }
 0x821   :  { %2703 = vmatpush3.bf16.msra.mxu1 %v2889_v9 }
 0x822   :  { %2704 = vmatprep.subr.bf16.mxu1 %v2802_v0 }
 0x8ef   :  { %v1289_v24 = vpop.f32.mrb[8].mxu1 }
 0x8f0   :  { %v2747_v25 = vadd.f32 %v2992_v37, %v1289_v24  ;;  %v2472_v27 = vpop.f32.mrb[9].mxu1 }
 0x8f2   :  { %2788 = vtanh.f32 %v2747_v25 }
 0x8fc   :  { %v2789_v28 = vpop.eup %2788 }
 0x8fd   :  { %2482 = vmatmul.mubr.msk.f32.vlgmr.msra.gmra.mrb[16].mxu0 %vm203_vm2, %v2789_v28 }
 0x8fe   :  { %2688 = vmatpush3.bf16.msra.mxu0 %v2905_v13  ;;  %2492 = vmatprep.mubr.msk.f32.mxu0 %vm2803_vm0, %v2804_v4 }
 0x8ff   :  { %2689 = vmatprep.subr.bf16.mxu0 %v2802_v0 }
 0x902   :  { %2691 = vmatpush3.bf16.msra.mxu0 %v2918_v16 }
 0x903   :  { %2692 = vmatprep.subr.bf16.mxu0 %v2802_v0 }
 0x905   :  { %2493 = vmatmul.mubr.msk.f32.vlgmr.msra.gmra.mrb[18].mxu0 %vm203_vm2, %v2787_v23 }
 0x906   :  { %2694 = vmatpush3.bf16.msra.mxu0 %v2939_v20  ;;  %2503 = vmatprep.mubr.msk.f32.mxu0 %vm2803_vm0, %v2804_v4 }
 0x907   :  { %2695 = vmatprep.subr.bf16.mxu0 %v2802_v0 }
 0x90a   :  { %2697 = vmatpush3.bf16.msra.mxu0 %v2945_v22 }
 0x90b   :  { %2716 = vmatprep.subr.bf16.mxu0 %v2802_v0 }
 0x9d8   :  { %v1433_v30 = vpop.f32.mrb[18].mxu0 }
 0x9d9   :  { %v1434_v31 = vadd.f32 %v1433_v30, %v183_v29  ;;  %v2494_v32 = vpop.f32.mrb[19].mxu0 }
 0x9db   :  { %2790 = vtanh.f32 %v1434_v31 }
 0x9e5   :  { %v2791_v33 = vpop.eup %2790 }
 0x9e6   :  { %2504 = vmatmul.mubr.msk.f32.vlgmr.msra.gmra.mrb[16].mxu0 %vm203_vm2, %v2791_v33 }
 0x9e7   :  { %2718 = vmatpush3.bf16.msra.mxu0 %v2877_v5  ;;  %2547 = vmatprep.mubr.msk.f32.mxu0 %vm2803_vm0, %v2804_v4  ;;  %v188_v5 = vadd.f32 %v2957_v26, %v3017_v47 }
 0x9e8   :  { %2719 = vmatprep.subr.bf16.mxu0 %v2802_v0 }
 0x9eb   :  { %2721 = vmatpush3.bf16.msra.mxu0 %v2889_v9 }
 0x9ec   :  { %2722 = vmatprep.subr.bf16.mxu0 %v2802_v0 }
 0xab9   :  { %v1507_v34 = vpop.f32.mrb[16].mxu0 }
 0xaba   :  { %v2748_v35 = vadd.f32 %v2992_v37, %v1507_v34  ;;  %v2505_v36 = vpop.f32.mrb[17].mxu0 }
 0xabc   :  { %2792 = vtanh.f32 %v2748_v35 }
 0xac6   :  { %v2793_v38 = vpop.eup %2792 }
 0xac7   :  { %2515 = vmatmul.mubr.msk.f32.vlgmr.msra.gmra.mrb[12].mxu1 %vm203_vm2, %v2793_v38 }
 0xac8   :  { %2706 = vmatpush3.bf16.msra.mxu1 %v2905_v13  ;;  %2525 = vmatprep.mubr.msk.f32.mxu1 %vm2803_vm0, %v2804_v4 }
 0xac9   :  { %2707 = vmatprep.subr.bf16.mxu1 %v2802_v0 }
 0xacc   :  { %2709 = vmatpush3.bf16.msra.mxu1 %v2918_v16 }
 0xacd   :  { %2710 = vmatprep.subr.bf16.mxu1 %v2802_v0 }
 0xacf   :  { %2526 = vmatmul.mubr.msk.f32.vlgmr.msra.gmra.mrb[14].mxu1 %vm203_vm2, %v2791_v33 }
 0xad0   :  { %2712 = vmatpush3.bf16.msra.mxu1 %v2939_v20  ;;  %2536 = vmatprep.mubr.msk.f32.mxu1 %vm2803_vm0, %v2804_v4 }
 0xad1   :  { %2713 = vmatprep.subr.bf16.mxu1 %v2802_v0 }
 0xad4   :  { %2715 = vmatpush3.bf16.msra.mxu1 %v2945_v22 }
 0xad5   :  { %2734 = vmatprep.subr.bf16.mxu1 %v2802_v0 }
 0xba2   :  { %v1651_v9 = vpop.f32.mrb[14].mxu1 }
 0xba3   :  { %v1652_v39 = vadd.f32 %v1651_v9, %v188_v5  ;;  %v2527_v40 = vpop.f32.mrb[15].mxu1 }
 0xba5   :  { %2794 = vtanh.f32 %v1652_v39 }
 0xbaf   :  { %v2795_v41 = vpop.eup %2794 }
 0xbb0   :  { %2537 = vmatmul.mubr.msk.f32.vlgmr.msra.gmra.mrb[12].mxu1 %vm203_vm2, %v2795_v41 }
 0xbb1   :  { %2580 = vmatprep.mubr.msk.f32.mxu1 %vm2803_vm0, %v2804_v4 }
 0xc83   :  { %v1725_v42 = vpop.f32.mrb[12].mxu1 }
 0xc84   :  { %v2749_v43 = vadd.f32 %v2992_v37, %v1725_v42  ;;  %v2538_v44 = vpop.f32.mrb[13].mxu1 }
 0xc86   :  { %2796 = vtanh.f32 %v2749_v43 }
 0xc90   :  { %v2797_v45 = vpop.eup %2796 }
 0xc91   :  { %2548 = vmatmul.mubr.msk.f32.vlgmr.msra.gmra.mrb[20].mxu0 %vm203_vm2, %v2797_v45 }
 0xc92   :  { %2724 = vmatpush3.bf16.msra.mxu0 %v2905_v13  ;;  %2558 = vmatprep.mubr.msk.f32.mxu0 %vm2803_vm0, %v2804_v4  ;;  %v193_v13 = vadd.f32 %v3015_v46, %v2957_v26  ;;  %v1951_v46 = vld [vmem:[%s3199_s7 + $0x18] sm:$0xff] }
 0xc93   :  { %2725 = vmatprep.subr.bf16.mxu0 %v2802_v0 }
 0xc96   :  { %2727 = vmatpush3.bf16.msra.mxu0 %v2918_v16 }
 0xc97   :  { %2728 = vmatprep.subr.bf16.mxu0 %v2802_v0 }
 0xc99   :  { %2559 = vmatmul.mubr.msk.f32.vlgmr.msra.gmra.mrb[22].mxu0 %vm203_vm2, %v2795_v41 }
 0xc9a   :  { %2730 = vmatpush3.bf16.msra.mxu0 %v2939_v20  ;;  %2569 = vmatprep.mubr.msk.f32.mxu0 %vm2803_vm0, %v2804_v4  ;;  %v1948_v20 = vld [vmem:[%s3199_s7] sm:$0xff] }
 0xc9b   :  { %2731 = vmatprep.subr.bf16.mxu0 %v2802_v0  ;;  %v2735_v26 = vpack.c.bf16 %v1949_v50, %v1948_v20 }
 0xc9d   :  { %2736 = vmatpush3.bf16.msra.mxu1 %v2735_v26 }
 0xc9e   :  { %2733 = vmatpush3.bf16.msra.mxu0 %v2945_v22  ;;  %v1950_v22 = vld [vmem:[%s3199_s7 + $0x10] sm:$0xff]  ;;  %2737 = vmatprep.subr.bf16.mxu1 %v2802_v0 }
 0xc9f   :  { %v2738_v51 = vpack.c.bf16 %v1951_v46, %v1950_v22 }
 0xca1   :  { %2739 = vmatpush3.bf16.msra.mxu1 %v2738_v51 }
 0xca2   :  { %2740 = vmatprep.subr.bf16.mxu1 %v2802_v0  ;;  %v2741_v0 = vpack.c.bf16 %v2034_v57, %v2033_v56 }
 0xd6c   :  { %v1869_v47 = vpop.f32.mrb[22].mxu0 }
 0xd6d   :  { %v1870_v48 = vadd.f32 %v1869_v47, %v193_v13  ;;  %v2560_v49 = vpop.f32.mrb[23].mxu0 }
 0xd6f   :  { %2798 = vtanh.f32 %v1870_v48 }
 0xd79   :  { %v2799_v16 = vpop.eup %2798 }
 0xd7a   :  { %2570 = vmatmul.mubr.msk.f32.vlgmr.msra.gmra.mrb[20].mxu0 %vm203_vm2, %v2799_v16 }
 0xe4d   :  { %v1943_v52 = vpop.f32.mrb[20].mxu0 }
 0xe4e   :  { %v2750_v53 = vadd.f32 %v2992_v37, %v1943_v52  ;;  %v2571_v54 = vpop.f32.mrb[21].mxu0  ;;  %v2153_v37 = vld [vmem:[%s3201_s8] ss:$0 sm:$0xff] }
 0xe50   :  { %2800 = vtanh.f32 %v2750_v53 }
 0xe5a   :  { %v2801_v55 = vpop.eup %2800 }
 0xe5b   :  { %2581 = vmatmul.mubr.msk.f32.vlgmr.msra.gmra.mrb[16].mxu1 %vm203_vm2, %v2801_v55 }
 0xe5c   :  { %2587 = vmatprep.mubr.msk.f32.mxu1 %vm2803_vm0, %v2804_v4  ;;  %2742 = vmatpush3.bf16.msra.mxu1 %v2741_v0  ;;  %v2155_v4 = vld [vmem:[%s3202_s10] ss:$0 sm:$0xff] }
 0xf2e   :  { %v2028_v58 = vpop.f32.mrb[16].mxu1 }
 0xf2f   :  { %v2029_v59 = vadd.f32 %v2153_v37, %v2028_v58  ;;  %v2582_v60 = vpop.f32.mrb[17].mxu1 }
 0xf31   :  { %v2032_v61 = vmax.f32 %v2029_v59, 0.0 }
 0xf33   :  { %2588 = vmatmul.mubr.msk.f32.vlgmr.msra.gmra.mrb[18].mxu1 %vm2042_vm3, %v2032_v61 }
0x1006   :  { %v2112_v62 = vpop.f32.mrb[18].mxu1 }
0x1007   :  { %v2113_v63 = vadd.f32 %v2155_v4, %v2112_v62  ;;  %v2589_v1 = vpop.f32.mrb[19].mxu1 }
0x1009   :  { %2116 = vst [vmem:[%s3203_s11] sm:$0xff] %v2113_v63 }

</bundles_post_ra>
